<compile_context>
chip_gen: v5e
topology: v5e:2x2
jax: 0.10.0
libtpu: 0.0.40
codegen_flags: <defaults>
</compile_context>

<pallas_src>
import functools

import jax
import jax.numpy as jnp
from jax.experimental import pallas as pl
from jax.experimental.pallas import tpu as pltpu


# --------------------------------------------------------------------------
# Helpers
# --------------------------------------------------------------------------
def _round_up(n, m):
    return ((n + m - 1) // m) * m


def _sublane_pack(itemsize):
    """Sublane packing: 8 for 4-byte, 16 for 2-byte, 32 for 1-byte dtypes."""
    return max(8, 32 // int(itemsize))


def _is_v7x():
    try:
        return "v7" in jax.devices()[0].device_kind.lower()
    except Exception:
        return False


def _mk_in_spec(shape, index_map, buffer_count):
    """Input BlockSpec; deeper pipelining only when explicitly requested."""
    if buffer_count is not None and buffer_count != 2:
        try:
            return pl.BlockSpec(shape, index_map,
                                pipeline_mode=pl.Buffered(int(buffer_count)))
        except TypeError:
            pass
    return pl.BlockSpec(shape, index_map)


# --------------------------------------------------------------------------
# Kernels
# --------------------------------------------------------------------------
def _fg2d_kernel(fg_ref, tf_ref, o_ref, *, tb, bs, need_mask):
    """2-D fast path: one (batch_tile, d_split, d_tile) step on (tb, td)
    blocks.  The '[:, 1:]' offset is already baked into the fg index_map."""
    dt = pl.program_id(2)

    @pl.when(dt == 0)
    def _():
        o_ref[...] = jnp.zeros_like(o_ref)

    diff = fg_ref[...].astype(jnp.float32) - tf_ref[...].astype(jnp.float32)

    if need_mask:
        bt = pl.program_id(0)
        is_tail = bt == pl.num_programs(0) - 1

        @pl.when(is_tail)
        def _():
            rows = jax.lax.broadcasted_iota(jnp.int32, diff.shape, 0) + bt * tb
            d = jnp.where(rows < bs, diff, 0.0)
            o_ref[...] += jnp.sum(d * d)

        @pl.when(jnp.logical_not(is_tail))
        def _():
            o_ref[...] += jnp.sum(diff * diff)
    else:
        o_ref[...] += jnp.sum(diff * diff)


def _fg3d_kernel(fg_ref, tf_ref, o_ref, *, tb, td, bs, d_total, need_mask):
    """3-D fallback (D not a multiple of 128): previous validated scheme."""
    dt = pl.program_id(1)

    @pl.when(dt == 0)
    def _():
        o_ref[...] = jnp.zeros_like(o_ref)

    nom1 = tf_ref.shape[1]                                     # num_obs - 1
    fg = fg_ref[:, pl.ds(1, nom1), :].astype(jnp.float32)      # (tb, nom1, td)
    tfg = tf_ref[...].astype(jnp.float32)
    diff = fg - tfg

    if need_mask:
        bt = pl.program_id(0)
        b_idx = jax.lax.broadcasted_iota(jnp.int32, diff.shape, 0) + bt * tb
        c_idx = jax.lax.broadcasted_iota(jnp.int32, diff.shape, 2) + dt * td
        diff = jnp.where((b_idx < bs) & (c_idx < d_total), diff, 0.0)

    o_ref[...] += jnp.sum(diff * diff)


# --------------------------------------------------------------------------
# Block-size selection
# --------------------------------------------------------------------------
def _choose_blocks_2d(bs, d, itemsize, budget, block_b, block_d):
    pack = _sublane_pack(itemsize)

    # Batch tile: full batch for small bs (legal: equals the array dim),
    # else a sublane-aligned multiple of 8.
    if block_b is None:
        tb = bs if bs <= 4 * pack else 4 * pack
    else:
        tb = max(1, min(int(block_b), bs))
        if tb != bs and tb % 8 != 0:
            tb = min(bs, max(8, (tb // 8) * 8))

    # D tile: largest divisor of D that is a multiple of 128 and fits the
    # per-block VMEM budget (layout-padded on the sublane axis).
    if block_d is not None:
        td = int(block_d)
        if td % 128 != 0 or d % td != 0 or td > d:
            raise ValueError("block_d must be a multiple of 128 dividing 3*h*w")
    else:
        max_td = max(128, (budget // (_round_up(tb, pack) * itemsize))
                     // 128 * 128)
        q = d // 128
        k = 1
        for cand in range(min(q, max_td // 128), 0, -1):
            if q % cand == 0:
                k = cand
                break
        td = 128 * k
    return int(tb), int(td)


def _choose_blocks_3d(bs, num_obs, d_total, itemsize, budget, block_b, block_d):
    pack = _sublane_pack(itemsize)
    sub = _round_up(num_obs, pack)           # padded sublanes of the fg block

    if block_d is None:
        if sub * _round_up(d_total, 128) * itemsize <= budget:
            block_d = d_total                # full spatial axis fits
        else:
            block_d = max(128, (budget // (sub * itemsize)) // 128 * 128)
    block_d = min(int(block_d), d_total)
    if block_d != d_total and block_d % 128 != 0:
        raise ValueError("block_d must equal 3*h*w or be a multiple of 128")

    if block_b is None:
        blk_bytes = sub * _round_up(block_d, 128) * itemsize
        block_b = max(1, budget // max(blk_bytes, 1))
    block_b = max(1, min(int(block_b), bs))
    return int(block_b), int(block_d)


# --------------------------------------------------------------------------
# Runners
# --------------------------------------------------------------------------
def _run_2d(fg, tf, bs, num_obs, d, itemsize, budget, buffer_count,
            block_b, block_d):
    nom1 = num_obs - 1
    pack = _sublane_pack(itemsize)
    tb, td = _choose_blocks_2d(bs, d, itemsize, budget, block_b, block_d)

    fg2 = fg.reshape(bs, num_obs * d)        # free trailing-dim collapse
    tf2 = tf.reshape(bs, nom1 * d)

    n_bt = pl.cdiv(bs, tb)
    n_dt = (nom1 * d) // td                  # exact: td | d -> no D remainder
    n_split = 2 if (n_dt >= 2 and n_dt % 2 == 0) else 1
    n_dt_in = n_dt // n_split
    d_off = d // td                          # block offset implementing [:, 1:]
    need_mask = (bs % tb) != 0               # only the batch tail can spill

    kernel = functools.partial(_fg2d_kernel, tb=tb, bs=bs, need_mask=need_mask)

    fg_spec = _mk_in_spec(
        (tb, td), lambda bt, sp, dt: (bt, d_off + sp * n_dt_in + dt),
        buffer_count)
    tf_spec = _mk_in_spec(
        (tb, td), lambda bt, sp, dt: (bt, sp * n_dt_in + dt),
        buffer_count)

    blk_bytes = _round_up(tb, pack) * td * itemsize
    vmem_limit = int(max(32 << 20,
                         2 * max(buffer_count, 2) * blk_bytes + (8 << 20)))

    partials = pl.pallas_call(
        kernel,
        out_shape=jax.ShapeDtypeStruct((n_bt, n_split, 1, 1), jnp.float32),
        grid_spec=pltpu.PrefetchScalarGridSpec(
            num_scalar_prefetch=0,
            grid=(n_bt, n_split, n_dt_in),        # reduction (D) axis last
            in_specs=[fg_spec, tf_spec],
            out_specs=pl.BlockSpec((1, 1, 1, 1),
                                   lambda bt, sp, dt: (bt, sp, 0, 0)),
        ),
        compiler_params=pltpu.CompilerParams(
            dimension_semantics=("parallel", "parallel", "arbitrary"),
            vmem_limit_bytes=vmem_limit),
    )(fg2, tf2)

    return jnp.sum(partials)


def _run_3d(fg, tf, bs, num_obs, d_total, itemsize, budget, buffer_count,
            block_b, block_d):
    nom1 = num_obs - 1
    pack = _sublane_pack(itemsize)
    tb, td = _choose_blocks_3d(bs, num_obs, d_total, itemsize, budget,
                               block_b, block_d)
    n_bt = pl.cdiv(bs, tb)
    n_dt = pl.cdiv(d_total, td)
    need_mask = (bs % tb != 0) or (d_total % td != 0)

    fg3 = fg.reshape(bs, num_obs, d_total)
    tf3 = tf.reshape(bs, nom1, d_total)

    kernel = functools.partial(_fg3d_kernel, tb=tb, td=td, bs=bs,
                               d_total=d_total, need_mask=need_mask)

    fg_blk = tb * _round_up(num_obs, pack) * _round_up(td, 128) * itemsize
    tf_blk = tb * _round_up(nom1, pack) * _round_up(td, 128) * itemsize
    vmem_limit = int(max(32 << 20,
                         max(buffer_count, 2) * (fg_blk + tf_blk) + (8 << 20)))

    partials = pl.pallas_call(
        kernel,
        out_shape=jax.ShapeDtypeStruct((n_bt, 1, 1), jnp.float32),
        grid_spec=pltpu.PrefetchScalarGridSpec(
            num_scalar_prefetch=0,
            grid=(n_bt, n_dt),
            in_specs=[
                _mk_in_spec((tb, num_obs, td), lambda bt, dt: (bt, 0, dt),
                            buffer_count),
                _mk_in_spec((tb, nom1, td), lambda bt, dt: (bt, 0, dt),
                            buffer_count),
            ],
            out_specs=pl.BlockSpec((1, 1, 1), lambda bt, dt: (bt, 0, 0)),
        ),
        compiler_params=pltpu.CompilerParams(
            dimension_semantics=("parallel", "arbitrary"),
            vmem_limit_bytes=vmem_limit),
    )(fg3, tf3)

    return jnp.sum(partials)


# --------------------------------------------------------------------------
# Public API
# --------------------------------------------------------------------------
def foreground_transform_loss_ref(foregrounds, transformed_foregrounds):
    """Pure-JAX reference (mirrors the PyTorch forward)."""
    a = foregrounds[:, 1:].astype(jnp.float32)
    b = transformed_foregrounds.astype(jnp.float32)
    return jnp.mean(jnp.square(a - b))


def foreground_transform_loss(foregrounds, transformed_foregrounds, *,
                              block_b=None, block_d=None, use_pallas=None,
                              buffer_count=None):
    """Pallas-TPU ForegroundTransformLoss forward. Returns a scalar f32."""
    bs, num_obs, c, h, w = foregrounds.shape
    bs2, nom1, c2, h2, w2 = transformed_foregrounds.shape
    assert (bs2, c2, h2, w2) == (bs, c, h, w) and nom1 == num_obs - 1, (
        "shape mismatch between foregrounds and transformed_foregrounds")
    assert num_obs >= 2, "need at least two observations"

    d_total = c * h * w
    n_elems = bs * nom1 * d_total

    # Small-input fast path: launch/pipeline overhead dominates tiny inputs.
    if use_pallas is None:
        use_pallas = n_elems >= (1 << 18)
    if not use_pallas:
        return foreground_transform_loss_ref(foregrounds,
                                             transformed_foregrounds)

    itemsize = jnp.dtype(foregrounds.dtype).itemsize
    v7 = _is_v7x()
    budget = (4 << 20) if v7 else (2 << 20)       # per-input block target
    if buffer_count is None:
        buffer_count = 3 if v7 else 2

    if d_total % 128 == 0:
        total = _run_2d(foregrounds, transformed_foregrounds, bs, num_obs,
                        d_total, itemsize, budget, buffer_count,
                        block_b, block_d)
    else:
        total = _run_3d(foregrounds, transformed_foregrounds, bs, num_obs,
                        d_total, itemsize, budget, buffer_count,
                        block_b, block_d)

    return total * jnp.float32(1.0 / n_elems)


# --------------------------------------------------------------------------
# Self-test
# --------------------------------------------------------------------------
if __name__ == "__main__":
    key = jax.random.PRNGKey(0)
    k1, k2, k3, k4, k5, k6 = jax.random.split(key, 6)

    # Test 1: f32, D % 128 == 0 -> 2-D fast path (no mask, no split).
    bs, num_obs, c, h, w = 2, 4, 3, 16, 16
    fg = jax.random.uniform(k1, (bs, num_obs, c, h, w), dtype=jnp.float32)
    tfg = jax.random.uniform(k2, (bs, num_obs - 1, c, h, w), dtype=jnp.float32)
    out = jax.block_until_ready(
        foreground_transform_loss(fg, tfg, use_pallas=True))
    ref = jax.block_until_ready(foreground_transform_loss_ref(fg, tfg))
    assert out.shape == (), f"expected scalar, got {out.shape}"
    assert abs(float(out) - float(ref)) < 1e-5, (float(out), float(ref))

    # Test 2: D % 128 != 0 -> 3-D fallback with batch and D remainder masks.
    bs, num_obs, c, h, w = 3, 3, 3, 10, 10
    fg2 = jax.random.uniform(k3, (bs, num_obs, c, h, w), dtype=jnp.float32)
    tfg2 = jax.random.uniform(k4, (bs, num_obs - 1, c, h, w),
                              dtype=jnp.float32)
    out2 = jax.block_until_ready(
        foreground_transform_loss(fg2, tfg2, use_pallas=True,
                                  block_b=2, block_d=128))
    ref2 = jax.block_until_ready(foreground_transform_loss_ref(fg2, tfg2))
    assert abs(float(out2) - float(ref2)) < 1e-5, (float(out2), float(ref2))

    # Test 3: bf16 on the 2-D path (in-kernel f32 cast, D-split parallel axis).
    bs, num_obs, c, h, w = 3, 3, 3, 16, 16
    fg3 = jax.random.uniform(k5, (bs, num_obs, c, h, w),
                             dtype=jnp.float32).astype(jnp.bfloat16)
    tfg3 = jax.random.uniform(k6, (bs, num_obs - 1, c, h, w),
                              dtype=jnp.float32).astype(jnp.bfloat16)
    out3 = jax.block_until_ready(
        foreground_transform_loss(fg3, tfg3, use_pallas=True))
    ref3 = jax.block_until_ready(foreground_transform_loss_ref(fg3, tfg3))
    assert abs(float(out3) - float(ref3)) < 1e-3, (float(out3), float(ref3))

    # Test 4: 2-D path with a masked batch tail (bs=10, tb=8).
    bs, num_obs, c, h, w = 10, 2, 3, 16, 16
    fg4 = jax.random.uniform(k1, (bs, num_obs, c, h, w), dtype=jnp.float32)
    tfg4 = jax.random.uniform(k2, (bs, num_obs - 1, c, h, w),
                              dtype=jnp.float32)
    out4 = jax.block_until_ready(
        foreground_transform_loss(fg4, tfg4, use_pallas=True, block_b=8))
    ref4 = jax.block_until_ready(foreground_transform_loss_ref(fg4, tfg4))
    assert abs(float(out4) - float(ref4)) < 1e-5, (float(out4), float(ref4))

    print("KERNEL_OK")
</pallas_src>

<mosaic_0001>
module attributes {stable_mosaic.version = 11 : i64} {
  func.func @_fg2d_kernel(%arg0: i32, %arg1: i32, %arg2: i32, %arg3: memref<2x768xf32, #tpu.memory_space<vmem>>, %arg4: memref<2x768xf32, #tpu.memory_space<vmem>>, %arg5: memref<1x1x1x1xf32, #tpu.memory_space<vmem>>) attributes {dimension_semantics = [#tpu.dimension_semantics<parallel>, #tpu.dimension_semantics<parallel>, #tpu.dimension_semantics<arbitrary>], iteration_bounds = array<i64: 1, 1, 3>, scalar_prefetch = 0 : i64, scratch_operands = 0 : i64, tpu.core_type = #tpu.core_type<tc>, window_params = [{transform_indices = @transform_0, window_bounds = array<i64: 2, 768>}, {transform_indices = @transform_1, window_bounds = array<i64: 2, 768>}, {transform_indices = @transform_2, window_bounds = array<i64: 1, 1, 1, 1>}]} {
    %c0_i32 = arith.constant 0 : i32
    %0 = arith.cmpi eq, %arg2, %c0_i32 : i32
    %1 = arith.extui %0 : i1 to i32
    %c0_i32_0 = arith.constant 0 : i32
    %2 = arith.cmpi ne, %1, %c0_i32_0 : i32
    scf.if %2 {
      %cst_12 = arith.constant 0.000000e+00 : f32
      %15 = vector.broadcast %cst_12 : f32 to vector<1x1x1x1xf32>
      %c0_13 = arith.constant 0 : index
      %c0_14 = arith.constant 0 : index
      %c0_15 = arith.constant 0 : index
      %c0_16 = arith.constant 0 : index
      %16 = vector.load %arg5[%c0_13, %c0_14, %c0_15, %c0_16] : memref<1x1x1x1xf32, #tpu.memory_space<vmem>>, vector<1x1x1x1xf32>
      tpu.vector_store %arg5[%c0_13, %c0_14, %c0_15, %c0_16], %15 {strides = array<i32>} : memref<1x1x1x1xf32, #tpu.memory_space<vmem>>, vector<1x1x1x1xf32>,
    } else {
    }
    %c0 = arith.constant 0 : index
    %c0_1 = arith.constant 0 : index
    %3 = vector.load %arg3[%c0, %c0_1] : memref<2x768xf32, #tpu.memory_space<vmem>>, vector<2x768xf32>
    %c0_2 = arith.constant 0 : index
    %c0_3 = arith.constant 0 : index
    %4 = vector.load %arg4[%c0_2, %c0_3] : memref<2x768xf32, #tpu.memory_space<vmem>>, vector<2x768xf32>
    %5 = arith.subf %3, %4 : vector<2x768xf32>
    %c0_4 = arith.constant 0 : index
    %c0_5 = arith.constant 0 : index
    %c0_6 = arith.constant 0 : index
    %c0_7 = arith.constant 0 : index
    %6 = vector.load %arg5[%c0_4, %c0_5, %c0_6, %c0_7] : memref<1x1x1x1xf32, #tpu.memory_space<vmem>>, vector<1x1x1x1xf32>
    %7 = arith.mulf %5, %5 : vector<2x768xf32>
    %8 = vector.shape_cast %7 : vector<2x768xf32> to vector<1x2x768xf32>
    %cst = arith.constant dense<0.000000e+00> : vector<1xf32>
    %9 = vector.multi_reduction <add>, %8, %cst [1, 2] : vector<1x2x768xf32> to vector<1xf32>
    %10 = vector.shape_cast %9 : vector<1xf32> to vector<1x1x1xf32>
    %11 = vector.extract %10[0, 0, 0] : f32 from vector<1x1x1xf32>
    %12 = vector.broadcast %11 : f32 to vector<1x1x1x1xf32>
    %13 = arith.addf %6, %12 : vector<1x1x1x1xf32>
    %c0_8 = arith.constant 0 : index
    %c0_9 = arith.constant 0 : index
    %c0_10 = arith.constant 0 : index
    %c0_11 = arith.constant 0 : index
    %14 = vector.load %arg5[%c0_8, %c0_9, %c0_10, %c0_11] : memref<1x1x1x1xf32, #tpu.memory_space<vmem>>, vector<1x1x1x1xf32>
    tpu.vector_store %arg5[%c0_8, %c0_9, %c0_10, %c0_11], %13 {strides = array<i32>} : memref<1x1x1x1xf32, #tpu.memory_space<vmem>>, vector<1x1x1x1xf32>,
    return
  }
  func.func @transform_0(%arg0: i32, %arg1: i32, %arg2: i32) -> (i32, i32) {
    %c3_i32 = arith.constant 3 : i32
    %0 = arith.muli %arg1, %c3_i32 : i32
    %c1_i32 = arith.constant 1 : i32
    %1 = arith.addi %c1_i32, %0 : i32
    %2 = arith.addi %1, %arg2 : i32
    %c0_i32 = arith.constant 0 : i32
    return %arg0, %2 : i32, i32
  }
  func.func @transform_1(%arg0: i32, %arg1: i32, %arg2: i32) -> (i32, i32) {
    %c3_i32 = arith.constant 3 : i32
    %0 = arith.muli %arg1, %c3_i32 : i32
    %1 = arith.addi %0, %arg2 : i32
    %c0_i32 = arith.constant 0 : i32
    return %arg0, %1 : i32, i32
  }
  func.func @transform_2(%arg0: i32, %arg1: i32, %arg2: i32) -> (i32, i32, i32, i32) {
    %c0_i32 = arith.constant 0 : i32
    %c0_i32_0 = arith.constant 0 : i32
    %c0_i32_1 = arith.constant 0 : i32
    return %arg0, %arg1, %c0_i32, %c0_i32_0 : i32, i32, i32, i32
  }
}

</mosaic_0001>

<bundles_post_ra>
// kernel: tpu_custom_call.1
= control target key start
LH: loop header
LB: loop body
LE: loop exit
PB: predicated region body
PF: predicated region fallthrough
CT: control target
= control target key end

     0   :  { %7 = vsyncpa [#allocation3], 0  ;;  %s876_s0 = inlined_call_operand.hbm [shape: f32[2,3072], index: 0, kind: input, shape index: {}]   ;;  %s877_s1 = inlined_call_operand.hbm [shape: f32[2,2304], index: 1, kind: input, shape index: {}]   ;;  %s878_s2 = inlined_call_operand.hbm [shape: f32[1,1,1,1], index: 2, kind: output, shape index: {}]  }
   0x1   :  { %9 = vsyncpa [#allocation3 + $0x1], 0 }
   0x2   :  { %10 = vsyncpa [#allocation6], 0 }
   0x3   :  { %12 = vsyncpa [#allocation6 + $0x1], 0 }
   0x4   :  { %13 = vsyncpa [#allocation4], 0  ;;  %s711_s9 = smov 0   ;;  %s713_s10 = smov 0  }
   0x5   :  { %s715_s11 = smov 0   ;;  %s717_s12 = smov 0  }
   0x6   :  { %s719_s13 = smov 0   ;;  %s721_s14 = smov 0  }
   0x7   :  { %s723_s15 = smov 0   ;;  %s725_s16 = smov 0  }
   0x8   :  { %s727_s17 = smov 0  }
   0x9 LB: > { %s412_s18 = sadd.s32 4294967295, %s692_s17   ;;  %s31_s19 = sadd.s32 1, %s688_s16  ;;  %s692_s17 = sphi %s727_s17, %s19_s17   ;;  %s688_s16 = sphi %s725_s16, %s892_s16   ;;  %s684_s15 = sphi %s723_s15, %s891_s15   ;;  %s680_s14 = sphi %s721_s14, %s890_s14   ;;  %s676_s13 = sphi %s719_s13, %s889_s13   ;;  %s672_s12 = sphi %s717_s12, %s888_s12   ;;  %s668_s11 = sphi %s715_s11, %s887_s11   ;;  %s664_s10 = sphi %s713_s10, %s886_s10   ;;  %s660_s9 = sphi %s711_s9, %s885_s9  }
   0xa   : > { %p32_p0 = scmp.ge.s32.totalorder %s31_s19, 3  ;;  %s53_s20 = sadd.s32 1, %s680_s14 }
   0xb   : > { %p60_p1 = scmp.ne.s32.totalorder %s680_s14, %s676_s13  ;;  %p61_p2 = scmp.eq.s32.totalorder %s692_s17, 0 }
   0xc   : > { %s760_s21 = scalar_select %p32_p0, 0, %s31_s19  }
   0xd   : > { %p764_p3 = por %p61_p2, %p60_p1  ;;  %p66_p4 = scmp.ne.s32.totalorder %s676_s13, %s672_s12 }
   0xe   : > { %s47_s23 = sadd.s32 1, %s760_s21  ;;  %p772_p5 = scmp.eq.s32.totalorder %s412_s18, 0 }
   0xf   : > { %s49_s25 = ssub.s32 %s31_s19, %s47_s23  ;;  %s81_s26 = ssub.s32 %s688_s16, %s760_s21 }
  0x10   : > { %p51_p6 = scmp.eq.s32.totalorder %s49_s25, 0  ;;  %p780_p7 = por %p772_p5, %p66_p4 }
  0x11   : > { %p784_p8 = scmp.eq.s32.totalorder %s81_s26, 0  ;;  %p445_p9 = scmp.lt.s32.totalorder %s692_s17, 3 }
  0x12   : > { %s789_s29 = scalar_select %p51_p6, %s680_s14, %s53_s20  }
  0x13   : > { %s150_s30 = sand.u32 1, %s680_s14   ;;  %s415_s4 = smul.u32 12, %s688_s16 }
  0x14   : > { %s424_s3 = smul.u32 12, %s150_s30  ;;  %p439_p10 = pnand %p445_p9, %p764_p3 }
  0x15   : > { %p417_p11 = scmp.ge.s32.totalorder %s692_s17, 1  ;;  %s345_s7 = scalar_lea.hbm %s876_s0, %s415_s4 }
  0x16   : > { %s154_s8 = scalar_lea.vmem [#allocation2], %s424_s3  ;;  %s346_s19 = scalar_lea.hbm %s345_s7, 12 }
  0x17   : > { %s168_s12 = sshll.u32 %s154_s8, 4  ;;  %s166_s20 = sshll.u32 %s346_s19, 4  ;;  %s169_s12 = int_to_ptr.vmem [resolvable:$true] %s168_s12  ;;  %s167_s20 = int_to_ptr.hbm [resolvable:$true] %s166_s20 }
  0x18   : > { %p197_p12 = scmp.lt.s32.totalorder %s692_s17, 4  ;;  %s151_s22 = scalar_lea.sflag [#allocation3], %s150_s30 }
  0x19   : > { %441 = dma.hbm_to_vmem [thread:$0]  (!%p439_p10), %s167_s20, 192, %s169_s12, %s151_s22  }
  0x1a   : > { %p803_p13 = pnand %p417_p11, %p197_p12  ;;  %s85_s25 = sadd.s32 1, %s668_s11 }
  0x1b   : > { %s811_s26 = scalar_select %p784_p8, %s668_s11, %s85_s25  }
  0x1c   : > { %p92_p0 = scmp.ne.s32.totalorder %s668_s11, %s664_s10  ;;  %p98_p1 = scmp.ne.s32.totalorder %s664_s10, %s660_s9 }
  0x1d   : > { %s175_s3 = sand.u32 1, %s668_s11   ;;  %s188_s7 = scalar_lea.hbm %s877_s1, %s415_s4 }
  0x1e   : > { %p94_p3 = por %p92_p0, %p61_p2  ;;  %p825_p4 = por %p98_p1, %p772_p5 }
  0x1f   : > { %s425_s8 = smul.u32 12, %s175_s3  ;;  %s190_s12 = sshll.u32 %s188_s7, 4  ;;  %s191_s12 = int_to_ptr.hbm [resolvable:$true] %s190_s12 }
  0x20   : > { %p442_p6 = pnand %p445_p9, %p94_p3  ;;  %s176_s9 = scalar_lea.sflag [#allocation6], %s175_s3 }
  0x21   : > { %s179_s28 = scalar_lea.vmem [#allocation5], %s425_s8  ;;  %201 = sbr.rel (%p803_p13) target bundleno = 264 (0x108), region = 28 }
  0x22   : > { %s192_s19 = sshll.u32 %s179_s28, 4  ;;  %s203_s24 = sand.u32 (!%p803_p13), 1, %s676_s13   ;;  %s193_s19 = int_to_ptr.vmem [resolvable:$true] %s192_s19 }
  0x23   : > { %444 = dma.hbm_to_vmem [thread:$0]  (!%p442_p6), %s191_s12, 192, %s193_s19, %s176_s9  }
  0x24   : > { %s426_s4 = smul.u32 (!%p803_p13), 12, %s203_s24  ;;  %s204_s20 = scalar_lea.sflag (!%p803_p13), [#allocation3], %s203_s24 }
  0x26   : > { %s207_s22 = scalar_lea.vmem [#allocation2], %s426_s4 }
  0x27   : > { %647 = dma.done.wait (%p780_p7), %s204_s20, 192  }
  0x28   : > { %649 = vsyncadd (%p780_p7), %s204_s20, 4294967104  ;;  %s213_s25 = sand.u32 1, %s664_s10  }
  0x29   : > { %s427_s5 = smul.u32 12, %s213_s25  ;;  %s214_s3 = scalar_lea.sflag [#allocation6], %s213_s25 }
  0x2b   : > { %s217_s6 = scalar_lea.vmem [#allocation5], %s427_s5 }
  0x2c   : > { %651 = dma.done.wait (%p825_p4), %s214_s3, 192  }
  0x2d   : > { %653 = vsyncadd (%p825_p4), %s214_s3, 4294967104  ;;  %p418_p2 = scmp.ne.s32.totalorder %s684_s15, 0 }
  0x2f   : > { %249 = sbr.rel (%p418_p2) target bundleno = 54 (0x36), region = 40 }
  0x34   : > { %vm250_vm0 = vcmask 0   ;;  %v694_v0 = vmov 0.0  }
  0x35   : > { %251 = vst.msk [vmem:[#allocation7] sm:$0x1] %vm250_vm0, %v694_v0 }
  0x36 PF: > { %v252_v1 = vld [vmem:[%s207_s22] sm:$0xff]  ;;  %v253_v2 = vld [vmem:[%s207_s22 + $0x8] sm:$0xf]  ;;  %v254_v3 = vld [vmem:[%s217_s6] sm:$0xff]  ;;  %vm278_vm1 = vcmask 1041408   ;;  %s695_s15 = smov [#allocation7]  }
  0x37   : > { %v255_v4 = vld [vmem:[%s217_s6 + $0x8] sm:$0xf]  ;;  %v256_v5 = vsub.f32 %v252_v1, %v254_v3  ;;  %s311_s27 = sshll.u32 %s695_s15, 4  ;;  %s313_s30 = sshll.u32 %s878_s2, 4  ;;  %vm301_vm2 = vcmask 0   ;;  %s312_s27 = int_to_ptr.vmem [resolvable:$true] %s311_s27  ;;  %s314_s30 = int_to_ptr.hbm [resolvable:$true] %s313_s30 }
  0x38   : > { %v257_v6 = vsub.f32 %v253_v2, %v255_v4  ;;  %p446_p5 = scmp.eq.s32.totalorder %s412_s18, 2 }
  0x39   : > { %v259_v7 = vmul.f32 %v256_v5, %v256_v5 }
  0x3a   : > { %v260_v8 = vmul.f32 %v257_v6, %v257_v6 }
  0x3b   : > { %263 = vst [vmem:[#allocation1] ss:$4 sm:$0xff] %v259_v7 }
  0x3c   : > { %265 = vst [vmem:[#allocation1 + $0x20] ss:$4 sm:$0xff] %v260_v8  ;;  %v258_v33 = vld [vmem:[#allocation7] sm:$0x1] }
  0x42   : > { %v266_v9 = vld.sshfl [vmem:[#allocation1] sm:$0xff pattern:$0x73625140]  ;;  %v267_v10 = vld.sshfl [vmem:[#allocation1 + $0x8] sm:$0xff pattern:$0x73625140] }
  0x43   : > { %v268_v11 = vld.sshfl [vmem:[#allocation1 + $0x10] sm:$0xff pattern:$0x73625140]  ;;  %v269_v12 = vld.sshfl [vmem:[#allocation1 + $0x18] sm:$0xff pattern:$0x73625140] }
  0x44   : > { %v279_v13 = vsel %vm278_vm1, %v266_v9, 0.0  ;;  %v280_v14 = vsel %vm278_vm1, %v267_v10, 0.0  ;;  %v282_v15 = vsel %vm278_vm1, %v268_v11, 0.0  ;;  %v270_v16 = vld.sshfl [vmem:[#allocation1 + $0x20] sm:$0xff pattern:$0x73625140] }
  0x45   : > { %v281_v17 = vadd.f32 %v280_v14, %v279_v13  ;;  %v284_v18 = vsel %vm278_vm1, %v269_v12, 0.0  ;;  %v271_v19 = vld.sshfl [vmem:[#allocation1 + $0x28] sm:$0xff pattern:$0x73625140]  ;;  %v286_v21 = vsel %vm278_vm1, %v270_v16, 0.0 }
  0x46   : > { %v288_v23 = vsel %vm278_vm1, %v271_v19, 0.0 }
  0x47   : > { %v283_v20 = vadd.f32 %v282_v15, %v281_v17 }
  0x49   : > { %v285_v22 = vadd.f32 %v284_v18, %v283_v20 }
  0x4b   : > { %v287_v24 = vadd.f32 %v286_v21, %v285_v22 }
  0x4d   : > { %v289_v25 = vadd.f32 %v288_v23, %v287_v24 }
  0x4f   : > { %290 = vadd.xlane.f32.xlu0 %v289_v25 }
  0xc2   : > { %v291_v26 = vpop.xlane.xlu0 %290 }
  0xc3   : > { %v292_v27 = vrot.slane %v291_v26, 4 }
  0xc5   : > { %v293_v28 = vadd.f32 %v292_v27, %v291_v26 }
  0xc7   : > { %v294_v29 = vrot.slane %v293_v28, 2 }
  0xc9   : > { %v295_v30 = vadd.f32 %v294_v29, %v293_v28 }
  0xcb   : > { %v296_v31 = vrot.slane %v295_v30, 1 }
  0xcd   : > { %v297_v32 = vadd.f32 %v296_v31, %v295_v30 }
  0xcf   : > { %428 = vpush %v297_v32 }
 0x100   : > { %s429_s8 = spop %428 }
 0x101   : > { %v299_v34 = vstv %s429_s8 }
 0x102   : > { %v300_v35 = vadd.f32 %v299_v34, %v258_v33 }
 0x104   : > { %302 = vst.msk [vmem:[#allocation7] sm:$0x1] %vm301_vm2, %v300_v35 }
 0x105   : > { %435 = dma.vmem_to_hbm [thread:$0]  (%p446_p5), %s312_s27, 16, %s314_s30, [#allocation4]  }
 0x106   : > { %655 = dma.done.wait (%p446_p5), [#allocation4], 16  }
 0x107   : > { %657 = vsyncadd (%p446_p5), [#allocation4], 4294967280 }
 0x108 PF: > { %s19_s17 = sadd.s32 1, %s692_s17   ;;  %s885_s9 = smov %s664_s10 }
 0x109   : > { %p16_p7 = scmp.ge.s32.totalorder %s19_s17, 5   ;;  %s886_s10 = smov %s668_s11 }
 0x10a   : > { %s887_s11 = smov %s811_s26  ;;  %s888_s12 = smov %s676_s13 }
 0x10b   : > { %s889_s13 = smov %s680_s14  ;;  %s890_s14 = smov %s789_s29 }
 0x10c   : > { %s891_s15 = smov %s688_s16  ;;  %s892_s16 = smov %s760_s21 }
 0x10d   :  { %18 = sbr.rel (!%p16_p7) target bundleno = 9 (0x9), region = 84 }
 0x112   :  { %327 = vsyncpa [#allocation3], 1 }
 0x113   :  { %329 = vsyncpa [#allocation3 + $0x1], 1 }
 0x114   :  { %330 = vsyncpa [#allocation6], 1 }
 0x115   :  { %332 = vsyncpa [#allocation6 + $0x1], 1 }
 0x116   :  { %333 = vsyncpa [#allocation4], 1 }
 0x117   :  { %335 = vsyncpa [#allocation4 + $0x1], 1 }

</bundles_post_ra>
